<compile_context>
chip_gen: v5e
topology: v5e:2x2
jax: 0.10.0
libtpu: 0.0.40
codegen_flags: <defaults>
</compile_context>

<pallas_src>
import math
import jax
import jax.numpy as jnp
from jax.experimental import pallas as pl
from jax.experimental.pallas import tpu as pltpu

# ----------------------------- model hyperparams -----------------------------
B = 2             # batch
M = 8             # number of latents (kv sequence length)
LATENT_DIM = 32   # kv_dim
NUM_CLASSES = 16  # q_dim == n_embd (n_heads = 1 -> head_dim = NUM_CLASSES)
HIDDEN = 4 * NUM_CLASSES
EPS = 1e-5

# ------------------- packed-slab layout (all offsets static) ------------------
# Weight slab: matrices stacked along rows, zero-padded to a common 64-wide lane
# extent.  Row offsets are multiples of 8 (sublane-tile aligned).
WKV_R0, WKV_R1 = 0, LATENT_DIM                        # fused [wk | wv] : (L, 2C)
WQ_R0,  WQ_R1  = WKV_R1, WKV_R1 + NUM_CLASSES         # wq * scale     : (C, C)
WP_R0,  WP_R1  = WQ_R1,  WQ_R1 + NUM_CLASSES          # wp             : (C, C)
W1_R0,  W1_R1  = WP_R1,  WP_R1 + NUM_CLASSES          # w1             : (C, 4C)
W2_R0,  W2_R1  = W1_R1,  W1_R1 + HIDDEN               # w2             : (4C, C)
WSLAB_SHAPE = (W2_R1, max(2 * NUM_CLASSES, HIDDEN))   # (144, 64)

# Vector slab: one parameter vector per row, zero-padded to 64 columns.
(V_TASK, V_LN1KV_G, V_LN1KV_B, V_LN1Q_G, V_LN1Q_B,
 V_BKV, V_BQ, V_BP, V_LN2_G, V_LN2_B, V_B1, V_B2) = range(12)
VSLAB_SHAPE = (12, max(2 * NUM_CLASSES, HIDDEN))      # (12, 64)


def _layernorm(x, g, b):
    mean = jnp.mean(x, axis=-1, keepdims=True)
    var = jnp.mean((x - mean) ** 2, axis=-1, keepdims=True)  # biased, like torch LN
    return (x - mean) * jax.lax.rsqrt(var + EPS) * g + b


def _gelu_exact(x):
    # torch.nn.GELU() default is the exact erf-based GELU.
    return 0.5 * x * (1.0 + jax.lax.erf(x * (1.0 / math.sqrt(2.0))))


# --------------------------------- kernel ------------------------------------
def decoder_kernel(latents_ref, wslab_ref, vslab_ref, out_ref):
    C, L, H = NUM_CLASSES, LATENT_DIM, HIDDEN

    def vec(r, n):                       # (1, n) parameter row
        return vslab_ref[r:r + 1, 0:n]

    # ---- weights (static ref slices into the packed slab: no extra DMAs) ----
    wkv = wslab_ref[WKV_R0:WKV_R1, 0:2 * C]     # (L, 2C)  = [wk | wv]
    wq  = wslab_ref[WQ_R0:WQ_R1, 0:C]           # (C, C)   scale pre-folded
    wp  = wslab_ref[WP_R0:WP_R1, 0:C]           # (C, C)
    w1  = wslab_ref[W1_R0:W1_R1, 0:H]           # (C, 4C)
    w2  = wslab_ref[W2_R0:W2_R1, 0:C]           # (4C, C)

    task = vec(V_TASK, C)                       # (1, C) shared query token

    # ---- query path (batch-invariant, computed once) ----
    q_n = _layernorm(task, vec(V_LN1Q_G, C), vec(V_LN1Q_B, C))
    qq = jnp.dot(q_n, wq, preferred_element_type=jnp.float32) + vec(V_BQ, C)   # (1, C)

    # ---- KV path: whole batch stacked as (B*M, L), fused K/V projection ----
    lat = latents_ref[...]                      # (B, M, L)
    b, m, _ = lat.shape
    kv2 = lat.reshape(b * m, L)
    kv_n = _layernorm(kv2, vec(V_LN1KV_G, L), vec(V_LN1KV_B, L))
    kvp = jnp.dot(kv_n, wkv, preferred_element_type=jnp.float32) + vec(V_BKV, 2 * C)
    kvp3 = kvp.reshape(b, m, 2 * C)
    k3 = kvp3[..., :C]                          # (B, M, C)
    v3 = kvp3[..., C:]                          # (B, M, C)

    # ---- single-head cross-attention, softmax over M per batch element ----
    qb = jnp.broadcast_to(qq[None, :, :], (b, 1, C))                            # (B, 1, C)
    s = jnp.einsum('bnc,bmc->bnm', qb, k3, preferred_element_type=jnp.float32)  # (B, 1, M)
    s = s - jnp.max(s, axis=-1, keepdims=True)
    p = jnp.exp(s)
    att = p / jnp.sum(p, axis=-1, keepdims=True)
    y = jnp.einsum('bnm,bmc->bnc', att, v3, preferred_element_type=jnp.float32)  # (B, 1, C)
    y2 = y.reshape(b, C)

    attn_out = jnp.dot(y2, wp, preferred_element_type=jnp.float32) + vec(V_BP, C)

    # ---- residual + MLP ----
    x = task + attn_out                          # (1,C) broadcast + (B,C)
    x_n = _layernorm(x, vec(V_LN2_G, C), vec(V_LN2_B, C))
    h = jnp.dot(x_n, w1, preferred_element_type=jnp.float32) + vec(V_B1, H)      # (B, 4C)
    h = _gelu_exact(h)
    out_ref[...] = x + jnp.dot(h, w2, preferred_element_type=jnp.float32) + vec(V_B2, C)


# ------------------------ parameter packing (done once) ------------------------
def pack_params(p):
    """Pack 18 tiny tensors into two slabs; fold the attention scale into wq/bq.
    Called once at init time, NOT per forward call."""
    scale = 1.0 / math.sqrt(NUM_CLASSES)         # head_dim = NUM_CLASSES (n_heads=1)

    wslab = jnp.zeros(WSLAB_SHAPE, jnp.float32)
    wslab = wslab.at[WKV_R0:WKV_R1, 0:2 * NUM_CLASSES].set(
        jnp.concatenate([p["wk"], p["wv"]], axis=1))
    wslab = wslab.at[WQ_R0:WQ_R1, 0:NUM_CLASSES].set(p["wq"] * scale)
    wslab = wslab.at[WP_R0:WP_R1, 0:NUM_CLASSES].set(p["wp"])
    wslab = wslab.at[W1_R0:W1_R1, 0:HIDDEN].set(p["w1"])
    wslab = wslab.at[W2_R0:W2_R1, 0:NUM_CLASSES].set(p["w2"])

    vslab = jnp.zeros(VSLAB_SHAPE, jnp.float32)

    def put(v, row, arr):
        return v.at[row:row + 1, 0:arr.shape[-1]].set(arr)

    vslab = put(vslab, V_TASK, p["task_ids"])
    vslab = put(vslab, V_LN1KV_G, p["ln1kv_g"])
    vslab = put(vslab, V_LN1KV_B, p["ln1kv_b"])
    vslab = put(vslab, V_LN1Q_G, p["ln1q_g"])
    vslab = put(vslab, V_LN1Q_B, p["ln1q_b"])
    vslab = put(vslab, V_BKV, jnp.concatenate([p["bk"], p["bv"]], axis=1))
    vslab = put(vslab, V_BQ, p["bq"] * scale)
    vslab = put(vslab, V_BP, p["bp"])
    vslab = put(vslab, V_LN2_G, p["ln2_g"])
    vslab = put(vslab, V_LN2_B, p["ln2_b"])
    vslab = put(vslab, V_B1, p["b1"])
    vslab = put(vslab, V_B2, p["b2"])

    return {"wslab": wslab, "vslab": vslab}


# --------------------------------- wrapper -----------------------------------
def classification_decoder(latents, packed):
    b, m, l = latents.shape
    c = NUM_CLASSES
    wslab, vslab = packed["wslab"], packed["vslab"]
    return pl.pallas_call(
        decoder_kernel,
        out_shape=jax.ShapeDtypeStruct((b, c), jnp.float32),
        grid=(1,),                                   # single step: whole problem fits easily
        in_specs=[
            pl.BlockSpec((b, m, l), lambda i: (0, 0, 0)),
            pl.BlockSpec(wslab.shape, lambda i: (0, 0)),
            pl.BlockSpec(vslab.shape, lambda i: (0, 0)),
        ],
        out_specs=pl.BlockSpec((b, c), lambda i: (0, 0)),
        compiler_params=pltpu.CompilerParams(dimension_semantics=("arbitrary",)),
    )(latents, wslab, vslab)


# ---------------------------- pure-JAX reference ------------------------------
def reference(latents, p):
    b = latents.shape[0]
    c = p["task_ids"].shape[-1]
    q_in = jnp.broadcast_to(p["task_ids"][None], (b, 1, c))       # repeat(b,1,1)

    kv_n = _layernorm(latents, p["ln1kv_g"], p["ln1kv_b"])
    q_n = _layernorm(q_in, p["ln1q_g"], p["ln1q_b"])

    k = kv_n @ p["wk"] + p["bk"]
    v = kv_n @ p["wv"] + p["bv"]
    qq = q_n @ p["wq"] + p["bq"]

    att = (qq @ jnp.swapaxes(k, -2, -1)) * (1.0 / math.sqrt(c))
    att = jax.nn.softmax(att, axis=-1)
    y = att @ v
    attn_out = y @ p["wp"] + p["bp"]

    x = q_in + attn_out
    x_n = _layernorm(x, p["ln2_g"], p["ln2_b"])
    h = _gelu_exact(x_n @ p["w1"] + p["b1"])
    out = x + (h @ p["w2"] + p["b2"])
    return out[:, 0, :]                                           # squeeze(1)


# --------------------------------- params ------------------------------------
def init_params(key):
    ks = jax.random.split(key, 8)

    def linear(k, fan_in, fan_out):
        kw, kb = jax.random.split(k)
        bound = 1.0 / math.sqrt(fan_in)
        w = jax.random.uniform(kw, (fan_in, fan_out), jnp.float32, -bound, bound)
        b = jax.random.uniform(kb, (1, fan_out), jnp.float32, -bound, bound)
        return w, b

    p = {}
    p["task_ids"] = jax.random.normal(ks[0], (1, NUM_CLASSES), jnp.float32)
    p["ln1kv_g"] = jnp.ones((1, LATENT_DIM), jnp.float32)
    p["ln1kv_b"] = jnp.zeros((1, LATENT_DIM), jnp.float32)
    p["ln1q_g"] = jnp.ones((1, NUM_CLASSES), jnp.float32)
    p["ln1q_b"] = jnp.zeros((1, NUM_CLASSES), jnp.float32)
    p["wk"], p["bk"] = linear(ks[1], LATENT_DIM, NUM_CLASSES)
    p["wq"], p["bq"] = linear(ks[2], NUM_CLASSES, NUM_CLASSES)
    p["wv"], p["bv"] = linear(ks[3], LATENT_DIM, NUM_CLASSES)
    p["wp"], p["bp"] = linear(ks[4], NUM_CLASSES, NUM_CLASSES)
    p["ln2_g"] = jnp.ones((1, NUM_CLASSES), jnp.float32)
    p["ln2_b"] = jnp.zeros((1, NUM_CLASSES), jnp.float32)
    p["w1"], p["b1"] = linear(ks[5], NUM_CLASSES, HIDDEN)
    p["w2"], p["b2"] = linear(ks[6], HIDDEN, NUM_CLASSES)
    return p


# ----------------------------------- main -------------------------------------
if __name__ == "__main__":
    key = jax.random.PRNGKey(0)
    k_param, k_x = jax.random.split(key)
    params = init_params(k_param)
    packed = pack_params(params)          # one-time packing, outside the call path
    latents = jax.random.normal(k_x, (B, M, LATENT_DIM), jnp.float32)

    logits = classification_decoder(latents, packed)
    logits = jax.block_until_ready(logits)

    ref = reference(latents, params)
    assert logits.shape == (B, NUM_CLASSES)
    assert jnp.allclose(logits, ref, rtol=1e-5, atol=1e-5), (
        f"max abs err {jnp.max(jnp.abs(logits - ref))}")
    print("KERNEL_OK")
</pallas_src>

<mosaic_0001>
module attributes {stable_mosaic.version = 11 : i64} {
  func.func @decoder_kernel(%arg0: i32, %arg1: memref<2x8x32xf32, #tpu.memory_space<vmem>>, %arg2: memref<144x64xf32, #tpu.memory_space<vmem>>, %arg3: memref<12x64xf32, #tpu.memory_space<vmem>>, %arg4: memref<2x16xf32, #tpu.memory_space<vmem>>) attributes {dimension_semantics = [#tpu.dimension_semantics<arbitrary>], iteration_bounds = array<i64: 1>, scalar_prefetch = 0 : i64, scratch_operands = 0 : i64, tpu.core_type = #tpu.core_type<tc>, window_params = [{pipeline_mode = #tpu.pipeline_mode<synchronous>, transform_indices = @transform_0, window_bounds = array<i64: 2, 8, 32>}, {pipeline_mode = #tpu.pipeline_mode<synchronous>, transform_indices = @transform_1, window_bounds = array<i64: 144, 64>}, {pipeline_mode = #tpu.pipeline_mode<synchronous>, transform_indices = @transform_2, window_bounds = array<i64: 12, 64>}, {pipeline_mode = #tpu.pipeline_mode<synchronous>, transform_indices = @transform_3, window_bounds = array<i64: 2, 16>}]} {
    %c0 = arith.constant 0 : index
    %c0_0 = arith.constant 0 : index
    %0 = vector.load %arg2[%c0, %c0_0] : memref<144x64xf32, #tpu.memory_space<vmem>>, vector<32x32xf32>
    %c32 = arith.constant 32 : index
    %c0_1 = arith.constant 0 : index
    %1 = vector.load %arg2[%c32, %c0_1] : memref<144x64xf32, #tpu.memory_space<vmem>>, vector<16x16xf32>
    %c48 = arith.constant 48 : index
    %c0_2 = arith.constant 0 : index
    %2 = vector.load %arg2[%c48, %c0_2] : memref<144x64xf32, #tpu.memory_space<vmem>>, vector<16x16xf32>
    %c64 = arith.constant 64 : index
    %c0_3 = arith.constant 0 : index
    %3 = vector.load %arg2[%c64, %c0_3] : memref<144x64xf32, #tpu.memory_space<vmem>>, vector<16x64xf32>
    %c80 = arith.constant 80 : index
    %c0_4 = arith.constant 0 : index
    %4 = vector.load %arg2[%c80, %c0_4] : memref<144x64xf32, #tpu.memory_space<vmem>>, vector<64x16xf32>
    %c0_5 = arith.constant 0 : index
    %c0_6 = arith.constant 0 : index
    %5 = vector.load %arg3[%c0_5, %c0_6] : memref<12x64xf32, #tpu.memory_space<vmem>>, vector<1x16xf32>
    %c3 = arith.constant 3 : index
    %c0_7 = arith.constant 0 : index
    %6 = vector.load %arg3[%c3, %c0_7] : memref<12x64xf32, #tpu.memory_space<vmem>>, vector<1x16xf32>
    %c4 = arith.constant 4 : index
    %c0_8 = arith.constant 0 : index
    %7 = vector.load %arg3[%c4, %c0_8] : memref<12x64xf32, #tpu.memory_space<vmem>>, vector<1x16xf32>
    %cst = arith.constant dense<0.000000e+00> : vector<1xf32>
    %8 = vector.multi_reduction <add>, %5, %cst [1] : vector<1x16xf32> to vector<1xf32>
    %9 = vector.shape_cast %8 : vector<1xf32> to vector<1x1xf32>
    %cst_9 = arith.constant 1.600000e+01 : f32
    %10 = vector.broadcast %cst_9 : f32 to vector<1x1xf32>
    %11 = arith.divf %9, %10 : vector<1x1xf32>
    %12 = vector.broadcast %11 : vector<1x1xf32> to vector<1x16xf32>
    %13 = arith.subf %5, %12 : vector<1x16xf32>
    %14 = arith.mulf %13, %13 : vector<1x16xf32>
    %cst_10 = arith.constant dense<0.000000e+00> : vector<1xf32>
    %15 = vector.multi_reduction <add>, %14, %cst_10 [1] : vector<1x16xf32> to vector<1xf32>
    %16 = vector.shape_cast %15 : vector<1xf32> to vector<1x1xf32>
    %cst_11 = arith.constant 1.600000e+01 : f32
    %17 = vector.broadcast %cst_11 : f32 to vector<1x1xf32>
    %18 = arith.divf %16, %17 : vector<1x1xf32>
    %19 = vector.broadcast %11 : vector<1x1xf32> to vector<1x16xf32>
    %20 = arith.subf %5, %19 : vector<1x16xf32>
    %cst_12 = arith.constant 9.99999974E-6 : f32
    %21 = vector.broadcast %cst_12 : f32 to vector<1x1xf32>
    %22 = arith.addf %18, %21 : vector<1x1xf32>
    %23 = math.rsqrt %22 : vector<1x1xf32>
    %24 = vector.broadcast %23 : vector<1x1xf32> to vector<1x16xf32>
    %25 = arith.mulf %20, %24 : vector<1x16xf32>
    %26 = arith.mulf %25, %6 : vector<1x16xf32>
    %27 = arith.addf %26, %7 : vector<1x16xf32>
    %cst_13 = arith.constant dense<0.000000e+00> : vector<1x16xf32>
    %28 = tpu.matmul %27, %1, %cst_13 {dimension_numbers = #tpu.dot_dimension_numbers<[1], [0], [0], [1], [0, 0, 1, 1], [], []>} : vector<1x16xf32>, vector<16x16xf32>, vector<1x16xf32> -> vector<1x16xf32>
    %c6 = arith.constant 6 : index
    %c0_14 = arith.constant 0 : index
    %29 = vector.load %arg3[%c6, %c0_14] : memref<12x64xf32, #tpu.memory_space<vmem>>, vector<1x16xf32>
    %30 = arith.addf %28, %29 : vector<1x16xf32>
    %c0_15 = arith.constant 0 : index
    %c0_16 = arith.constant 0 : index
    %c0_17 = arith.constant 0 : index
    %31 = vector.load %arg1[%c0_15, %c0_16, %c0_17] : memref<2x8x32xf32, #tpu.memory_space<vmem>>, vector<2x8x32xf32>
    %32 = vector.shape_cast %31 : vector<2x8x32xf32> to vector<16x32xf32>
    %c1 = arith.constant 1 : index
    %c0_18 = arith.constant 0 : index
    %33 = vector.load %arg3[%c1, %c0_18] : memref<12x64xf32, #tpu.memory_space<vmem>>, vector<1x32xf32>
    %c2 = arith.constant 2 : index
    %c0_19 = arith.constant 0 : index
    %34 = vector.load %arg3[%c2, %c0_19] : memref<12x64xf32, #tpu.memory_space<vmem>>, vector<1x32xf32>
    %cst_20 = arith.constant dense<0.000000e+00> : vector<16xf32>
    %35 = vector.multi_reduction <add>, %32, %cst_20 [1] : vector<16x32xf32> to vector<16xf32>
    %36 = vector.shape_cast %35 : vector<16xf32> to vector<16x1xf32>
    %cst_21 = arith.constant 3.200000e+01 : f32
    %37 = vector.broadcast %cst_21 : f32 to vector<16x1xf32>
    %38 = arith.divf %36, %37 : vector<16x1xf32>
    %39 = vector.broadcast %38 : vector<16x1xf32> to vector<16x32xf32>
    %40 = arith.subf %32, %39 : vector<16x32xf32>
    %41 = arith.mulf %40, %40 : vector<16x32xf32>
    %cst_22 = arith.constant dense<0.000000e+00> : vector<16xf32>
    %42 = vector.multi_reduction <add>, %41, %cst_22 [1] : vector<16x32xf32> to vector<16xf32>
    %43 = vector.shape_cast %42 : vector<16xf32> to vector<16x1xf32>
    %cst_23 = arith.constant 3.200000e+01 : f32
    %44 = vector.broadcast %cst_23 : f32 to vector<16x1xf32>
    %45 = arith.divf %43, %44 : vector<16x1xf32>
    %46 = vector.broadcast %38 : vector<16x1xf32> to vector<16x32xf32>
    %47 = arith.subf %32, %46 : vector<16x32xf32>
    %cst_24 = arith.constant 9.99999974E-6 : f32
    %48 = vector.broadcast %cst_24 : f32 to vector<16x1xf32>
    %49 = arith.addf %45, %48 : vector<16x1xf32>
    %50 = math.rsqrt %49 : vector<16x1xf32>
    %51 = vector.broadcast %50 : vector<16x1xf32> to vector<16x32xf32>
    %52 = arith.mulf %47, %51 : vector<16x32xf32>
    %53 = vector.broadcast %33 : vector<1x32xf32> to vector<16x32xf32>
    %54 = arith.mulf %52, %53 : vector<16x32xf32>
    %55 = vector.broadcast %34 : vector<1x32xf32> to vector<16x32xf32>
    %56 = arith.addf %54, %55 : vector<16x32xf32>
    %cst_25 = arith.constant dense<0.000000e+00> : vector<16x32xf32>
    %57 = tpu.matmul %56, %0, %cst_25 {dimension_numbers = #tpu.dot_dimension_numbers<[1], [0], [0], [1], [0, 0, 1, 1], [], []>} : vector<16x32xf32>, vector<32x32xf32>, vector<16x32xf32> -> vector<16x32xf32>
    %c5 = arith.constant 5 : index
    %c0_26 = arith.constant 0 : index
    %58 = vector.load %arg3[%c5, %c0_26] : memref<12x64xf32, #tpu.memory_space<vmem>>, vector<1x32xf32>
    %59 = vector.broadcast %58 : vector<1x32xf32> to vector<16x32xf32>
    %60 = arith.addf %57, %59 : vector<16x32xf32>
    %61 = vector.shape_cast %60 : vector<16x32xf32> to vector<2x8x32xf32>
    %62 = vector.extract_strided_slice %61 {offsets = [0, 0, 0], sizes = [2, 8, 16], strides = [1, 1, 1]} : vector<2x8x32xf32> to vector<2x8x16xf32>
    %63 = vector.extract_strided_slice %61 {offsets = [0, 0, 16], sizes = [2, 8, 16], strides = [1, 1, 1]} : vector<2x8x32xf32> to vector<2x8x16xf32>
    %64 = vector.shape_cast %30 : vector<1x16xf32> to vector<1x1x16xf32>
    %65 = vector.shape_cast %64 : vector<1x1x16xf32> to vector<1x1x16xf32>
    %66 = vector.broadcast %65 : vector<1x1x16xf32> to vector<2x1x16xf32>
    "tpu.trace_start"() <{level = 10 : i32, message = "bnc,bmc->bnm"}> : () -> ()
    %cst_27 = arith.constant dense<0.000000e+00> : vector<2x1x8xf32>
    %67 = tpu.matmul %66, %62, %cst_27 {dimension_numbers = #tpu.dot_dimension_numbers<[2], [2], [1], [1], [0, 0, 0, 1, 1, 1], [0], [0]>} : vector<2x1x16xf32>, vector<2x8x16xf32>, vector<2x1x8xf32> -> vector<2x1x8xf32>
    "tpu.trace_stop"() : () -> ()
    %cst_28 = arith.constant dense<0xFF800000> : vector<2x1xf32>
    %68 = vector.multi_reduction <maximumf>, %67, %cst_28 [2] : vector<2x1x8xf32> to vector<2x1xf32>
    %69 = vector.shape_cast %68 : vector<2x1xf32> to vector<2x1x1xf32>
    %70 = vector.broadcast %69 : vector<2x1x1xf32> to vector<2x1x8xf32>
    %71 = arith.subf %67, %70 : vector<2x1x8xf32>
    %72 = math.exp %71 : vector<2x1x8xf32>
    %cst_29 = arith.constant dense<0.000000e+00> : vector<2x1xf32>
    %73 = vector.multi_reduction <add>, %72, %cst_29 [2] : vector<2x1x8xf32> to vector<2x1xf32>
    %74 = vector.shape_cast %73 : vector<2x1xf32> to vector<2x1x1xf32>
    %75 = vector.broadcast %74 : vector<2x1x1xf32> to vector<2x1x8xf32>
    %76 = arith.divf %72, %75 : vector<2x1x8xf32>
    "tpu.trace_start"() <{level = 10 : i32, message = "bnm,bmc->bnc"}> : () -> ()
    %cst_30 = arith.constant dense<0.000000e+00> : vector<2x1x16xf32>
    %77 = tpu.matmul %76, %63, %cst_30 {dimension_numbers = #tpu.dot_dimension_numbers<[2], [1], [1], [2], [0, 0, 0, 1, 1, 2], [0], [0]>} : vector<2x1x8xf32>, vector<2x8x16xf32>, vector<2x1x16xf32> -> vector<2x1x16xf32>
    "tpu.trace_stop"() : () -> ()
    %78 = vector.shape_cast %77 : vector<2x1x16xf32> to vector<2x16xf32>
    %cst_31 = arith.constant dense<0.000000e+00> : vector<2x16xf32>
    %79 = tpu.matmul %78, %2, %cst_31 {dimension_numbers = #tpu.dot_dimension_numbers<[1], [0], [0], [1], [0, 0, 1, 1], [], []>} : vector<2x16xf32>, vector<16x16xf32>, vector<2x16xf32> -> vector<2x16xf32>
    %c7 = arith.constant 7 : index
    %c0_32 = arith.constant 0 : index
    %80 = vector.load %arg3[%c7, %c0_32] : memref<12x64xf32, #tpu.memory_space<vmem>>, vector<1x16xf32>
    %81 = vector.broadcast %80 : vector<1x16xf32> to vector<2x16xf32>
    %82 = arith.addf %79, %81 : vector<2x16xf32>
    %83 = vector.broadcast %5 : vector<1x16xf32> to vector<2x16xf32>
    %84 = arith.addf %83, %82 : vector<2x16xf32>
    %c8 = arith.constant 8 : index
    %c0_33 = arith.constant 0 : index
    %85 = vector.load %arg3[%c8, %c0_33] : memref<12x64xf32, #tpu.memory_space<vmem>>, vector<1x16xf32>
    %c9 = arith.constant 9 : index
    %c0_34 = arith.constant 0 : index
    %86 = vector.load %arg3[%c9, %c0_34] : memref<12x64xf32, #tpu.memory_space<vmem>>, vector<1x16xf32>
    %cst_35 = arith.constant dense<0.000000e+00> : vector<2xf32>
    %87 = vector.multi_reduction <add>, %84, %cst_35 [1] : vector<2x16xf32> to vector<2xf32>
    %88 = vector.shape_cast %87 : vector<2xf32> to vector<2x1xf32>
    %cst_36 = arith.constant 1.600000e+01 : f32
    %89 = vector.broadcast %cst_36 : f32 to vector<2x1xf32>
    %90 = arith.divf %88, %89 : vector<2x1xf32>
    %91 = vector.broadcast %90 : vector<2x1xf32> to vector<2x16xf32>
    %92 = arith.subf %84, %91 : vector<2x16xf32>
    %93 = arith.mulf %92, %92 : vector<2x16xf32>
    %cst_37 = arith.constant dense<0.000000e+00> : vector<2xf32>
    %94 = vector.multi_reduction <add>, %93, %cst_37 [1] : vector<2x16xf32> to vector<2xf32>
    %95 = vector.shape_cast %94 : vector<2xf32> to vector<2x1xf32>
    %cst_38 = arith.constant 1.600000e+01 : f32
    %96 = vector.broadcast %cst_38 : f32 to vector<2x1xf32>
    %97 = arith.divf %95, %96 : vector<2x1xf32>
    %98 = vector.broadcast %90 : vector<2x1xf32> to vector<2x16xf32>
    %99 = arith.subf %84, %98 : vector<2x16xf32>
    %cst_39 = arith.constant 9.99999974E-6 : f32
    %100 = vector.broadcast %cst_39 : f32 to vector<2x1xf32>
    %101 = arith.addf %97, %100 : vector<2x1xf32>
    %102 = math.rsqrt %101 : vector<2x1xf32>
    %103 = vector.broadcast %102 : vector<2x1xf32> to vector<2x16xf32>
    %104 = arith.mulf %99, %103 : vector<2x16xf32>
    %105 = vector.broadcast %85 : vector<1x16xf32> to vector<2x16xf32>
    %106 = arith.mulf %104, %105 : vector<2x16xf32>
    %107 = vector.broadcast %86 : vector<1x16xf32> to vector<2x16xf32>
    %108 = arith.addf %106, %107 : vector<2x16xf32>
    %cst_40 = arith.constant dense<0.000000e+00> : vector<2x64xf32>
    %109 = tpu.matmul %108, %3, %cst_40 {dimension_numbers = #tpu.dot_dimension_numbers<[1], [0], [0], [1], [0, 0, 1, 1], [], []>} : vector<2x16xf32>, vector<16x64xf32>, vector<2x64xf32> -> vector<2x64xf32>
    %c10 = arith.constant 10 : index
    %c0_41 = arith.constant 0 : index
    %110 = vector.load %arg3[%c10, %c0_41] : memref<12x64xf32, #tpu.memory_space<vmem>>, vector<1x64xf32>
    %111 = vector.broadcast %110 : vector<1x64xf32> to vector<2x64xf32>
    %112 = arith.addf %109, %111 : vector<2x64xf32>
    %cst_42 = arith.constant 5.000000e-01 : f32
    %113 = vector.broadcast %cst_42 : f32 to vector<2x64xf32>
    %114 = arith.mulf %113, %112 : vector<2x64xf32>
    %cst_43 = arith.constant 0.707106769 : f32
    %115 = vector.broadcast %cst_43 : f32 to vector<2x64xf32>
    %116 = arith.mulf %112, %115 : vector<2x64xf32>
    %117 = math.erf %116 : vector<2x64xf32>
    %cst_44 = arith.constant 1.000000e+00 : f32
    %118 = vector.broadcast %cst_44 : f32 to vector<2x64xf32>
    %119 = arith.addf %118, %117 : vector<2x64xf32>
    %120 = arith.mulf %114, %119 : vector<2x64xf32>
    %cst_45 = arith.constant dense<0.000000e+00> : vector<2x16xf32>
    %121 = tpu.matmul %120, %4, %cst_45 {dimension_numbers = #tpu.dot_dimension_numbers<[1], [0], [0], [1], [0, 0, 1, 1], [], []>} : vector<2x64xf32>, vector<64x16xf32>, vector<2x16xf32> -> vector<2x16xf32>
    %122 = arith.addf %84, %121 : vector<2x16xf32>
    %c11 = arith.constant 11 : index
    %c0_46 = arith.constant 0 : index
    %123 = vector.load %arg3[%c11, %c0_46] : memref<12x64xf32, #tpu.memory_space<vmem>>, vector<1x16xf32>
    %124 = vector.broadcast %123 : vector<1x16xf32> to vector<2x16xf32>
    %125 = arith.addf %122, %124 : vector<2x16xf32>
    %c0_47 = arith.constant 0 : index
    %c0_48 = arith.constant 0 : index
    %126 = vector.load %arg4[%c0_47, %c0_48] : memref<2x16xf32, #tpu.memory_space<vmem>>, vector<2x16xf32>
    tpu.vector_store %arg4[%c0_47, %c0_48], %125 {strides = array<i32>} : memref<2x16xf32, #tpu.memory_space<vmem>>, vector<2x16xf32>,
    return
  }
  func.func @transform_0(%arg0: i32) -> (i32, i32, i32) {
    %c0_i32 = arith.constant 0 : i32
    %c0_i32_0 = arith.constant 0 : i32
    %c0_i32_1 = arith.constant 0 : i32
    %c0_i32_2 = arith.constant 0 : i32
    return %c0_i32, %c0_i32_0, %c0_i32_1 : i32, i32, i32
  }
  func.func @transform_1(%arg0: i32) -> (i32, i32) {
    %c0_i32 = arith.constant 0 : i32
    %c0_i32_0 = arith.constant 0 : i32
    %c0_i32_1 = arith.constant 0 : i32
    return %c0_i32, %c0_i32_0 : i32, i32
  }
  func.func @transform_2(%arg0: i32) -> (i32, i32) {
    %c0_i32 = arith.constant 0 : i32
    %c0_i32_0 = arith.constant 0 : i32
    %c0_i32_1 = arith.constant 0 : i32
    return %c0_i32, %c0_i32_0 : i32, i32
  }
  func.func @transform_3(%arg0: i32) -> (i32, i32) {
    %c0_i32 = arith.constant 0 : i32
    %c0_i32_0 = arith.constant 0 : i32
    %c0_i32_1 = arith.constant 0 : i32
    return %c0_i32, %c0_i32_0 : i32, i32
  }
}

</mosaic_0001>

<bundles_post_ra>
// kernel: tpu_custom_call.1
= control target key start
LH: loop header
LB: loop body
LE: loop exit
PB: predicated region body
PF: predicated region fallthrough
CT: control target
= control target key end

     0   :  { %vm97_vm0 = vcmask 261120   ;;  %vm36_vm1 = vcmask 122880   ;;  %s749_s0 = inlined_call_operand.vmem [shape: f32[2,8,32], index: 0, kind: input, shape index: {}]   ;;  %s750_s1 = inlined_call_operand.vmem [shape: f32[144,64], index: 1, kind: input, shape index: {}]   ;;  %s751_s2 = inlined_call_operand.vmem [shape: f32[12,64], index: 2, kind: input, shape index: {}]   ;;  %s752_s3 = inlined_call_operand.hbm [shape: f32[2,16], index: 3, kind: output, shape index: {}]  }
   0x1   :  { %v93_v0 = vld [vmem:[%s749_s0] sm:$0xff]  ;;  %v94_v4 = vld [vmem:[%s749_s0 + $0x8] sm:$0xff] }
   0x2   :  { %v33_v1 = vld [vmem:[%s751_s2] sm:$0x1]  ;;  %v98_v2 = vsel %vm97_vm0, %v93_v0, 0.0 }
   0x3   :  { %v37_v3 = vsel %vm36_vm1, %v33_v1, 0.0  ;;  %99 = vadd.xlane.f32.xlu0 %v98_v2 }
   0x4   :  { %38 = vadd.xlane.f32.xlu1 %v37_v3 }
   0x5   :  { %8 = vsyncpa [#allocation3], 0  ;;  %v101_v5 = vsel %vm97_vm0, %v94_v4, 0.0  ;;  %v585_v6 = vmov 32.0   ;;  %v586_v8 = vmov 16.0   ;;  %v18_v35 = vld [vmem:[%s750_s1 + $0x18] sm:$0xff] }
   0x6   :  { %537 = vrcp.f32 %v585_v6  ;;  %175 = vmatpush.msra.mxu1 %v18_v35  ;;  %v17_v36 = vld [vmem:[%s750_s1 + $0x10] sm:$0xff]  ;;  %v16_v37 = vld [vmem:[%s750_s1 + $0x8] sm:$0xff]  ;;  %v15_v38 = vld [vmem:[%s750_s1] sm:$0xff]  ;;  %vm69_vm13 = vcmask 130048   ;;  %vm235_vm14 = vcmask 57344   ;;  %s587_s14 = smov 112  }
   0x7   :  { %539 = vrcp.f32 %v586_v8  ;;  %v20_v42 = vld [vmem:[%s750_s1 + $0x28] sm:$0xff]  ;;  %v19_v43 = vld [vmem:[%s750_s1 + $0x20] sm:$0xff]  ;;  %s588_s21 = smov [#allocation2]   ;;  %s502_s25 = sshll.u32 %s752_s3, 4  ;;  %s503_s25 = int_to_ptr.hbm [resolvable:$true] %s502_s25 }
   0x8   :  { %176 = vmatpush.msra.mxu1 %v17_v36  ;;  %87 = vmatpush.msra.mxu0 %v20_v42  ;;  %v529_v58 = vld [vmem:[%s751_s2 + $0x1] ss:$0 sm:$0xff]  ;;  %v530_v62 = vld [vmem:[%s751_s2 + $0x2] ss:$0 sm:$0xff]  ;;  %s500_s22 = sshll.u32 %s588_s21, 4  ;;  %s501_s22 = int_to_ptr.vmem [resolvable:$true] %s500_s22 }
   0xa   :  { %177 = vmatpush.msra.mxu1 %v16_v37  ;;  %88 = vmatpush.msra.mxu0 %v19_v43 }
   0xb   :  { %102 = vadd.xlane.f32.xlu0 %v101_v5 }
   0xc   :  { %v538_v7 = vpop.eup %537  ;;  %178 = vmatpush.msra.mxu1 %v15_v38 }
   0xd   :  { %v105_v9 = vmul.f32 32.0, %v538_v7  ;;  %v540_v11 = vpop.eup %539  ;;  %vm109_vm2 = vweird.f32 %v538_v7 }
   0xe   :  { %v41_v13 = vmul.f32 16.0, %v540_v11  ;;  %vm45_vm3 = vweird.f32 %v540_v11 }
   0xf   :  { %v106_v10 = vsub.f32 1.0, %v105_v9 }
  0x10   :  { %v42_v15 = vsub.f32 1.0, %v41_v13 }
  0x11   :  { %v107_v12 = vmul.f32 %v538_v7, %v106_v10 }
  0x12   :  { %v43_v17 = vmul.f32 %v540_v11, %v42_v15  ;;  %v34_v15 = vld [vmem:[%s751_s2 + $0x3] sm:$0x1] }
  0x13   :  { %v108_v14 = vadd.f32 %v538_v7, %v107_v12 }
  0x14   :  { %v44_v20 = vadd.f32 %v540_v11, %v43_v17  ;;  %v35_v17 = vld [vmem:[%s751_s2 + $0x4] sm:$0x1] }
  0x15   :  { %v110_v16 = vsel %vm109_vm2, %v538_v7, %v108_v14 }
  0x16   :  { %v621_v23 = vsel %vm45_vm3, %v540_v11, %v44_v20  ;;  %v531_v20 = vld [vmem:[%s751_s2 + $0x5] ss:$0 sm:$0xff] }
  0x76   :  { %v100_v18 = vpop.xlane.xlu0 %99 }
  0x77   :  { %v111_v19 = vmul.f32 %v110_v16, %v100_v18  ;;  %v39_v24 = vpop.xlane.xlu1 %38 }
  0x78   :  { %v47_v28 = vmul.f32 %v621_v23, %v39_v24 }
  0x79   :  { %v113_v21 = vsub.f32 %v93_v0, %v111_v19 }
  0x7a   :  { %v625_v31 = vsub.f32 %v33_v1, %v47_v28 }
  0x7b   :  { %v115_v22 = vmul.f32 %v113_v21, %v113_v21 }
  0x7c   :  { %v49_v33 = vmul.f32 %v625_v31, %v625_v31 }
  0x7d   :  { %v117_v25 = vsel %vm97_vm0, %v115_v22, 0.0 }
  0x7e   :  { %v103_v26 = vpop.xlane.xlu0 %102  ;;  %118 = vadd.xlane.f32.xlu1 %v117_v25  ;;  %v50_v34 = vsel %vm36_vm1, %v49_v33, 0.0 }
  0x7f   :  { %v112_v27 = vmul.f32 %v110_v16, %v103_v26  ;;  %v68_v26 = vld [vmem:[%s751_s2 + $0x6] sm:$0x1] }
  0x81   :  { %v114_v29 = vsub.f32 %v94_v4, %v112_v27 }
  0x83   :  { %v116_v30 = vmul.f32 %v114_v29, %v114_v29 }
  0x85   :  { %v120_v32 = vsel %vm97_vm0, %v116_v30, 0.0 }
  0x86   :  { %121 = vadd.xlane.f32.xlu2 %v120_v32 }
  0x8e   :  { %51 = vadd.xlane.f32.xlu2 %v50_v34 }
  0xf1   :  { %v119_v39 = vpop.xlane.xlu1 %118 }
  0xf2   :  { %v123_v40 = vmul.f32 %v119_v39, %v110_v16 }
  0xf4   :  { %v125_v41 = vadd.f32 1e-05, %v123_v40 }
  0xf6   :  { %541 = vrsqrt.f32 %v125_v41  ;;  %vm133_vm5 = vweird.f32 %v125_v41 }
  0xf9   :  { %v122_v44 = vpop.xlane.xlu2 %121 }
  0xfa   :  { %v124_v45 = vmul.f32 %v122_v44, %v110_v16 }
  0xfc   :  { %v542_v46 = vpop.eup %541  ;;  %v126_v47 = vadd.f32 1e-05, %v124_v45 }
  0xfd   :  { %v128_v48 = vmul.f32 %v542_v46, %v125_v41  ;;  %vm134_vm4 = vweird.f32 %v542_v46 }
  0xfe   :  { %543 = vrsqrt.f32 %v126_v47  ;;  %vm135_vm6 = vmor %vm133_vm5, %vm134_vm4  ;;  %vm143_vm8 = vweird.f32 %v126_v47 }
  0xff   :  { %v129_v49 = vmul.f32 %v542_v46, %v128_v48 }
 0x101   :  { %v130_v50 = vmul.f32 0.5, %v129_v49  ;;  %v52_v51 = vpop.xlane.xlu2 %51 }
 0x102   :  { %v53_v52 = vmul.f32 %v52_v51, %v621_v23 }
 0x103   :  { %v131_v53 = vsub.f32 1.5, %v130_v50 }
 0x104   :  { %v544_v54 = vpop.eup %543  ;;  %v54_v55 = vadd.f32 1e-05, %v53_v52 }
 0x105   :  { %v132_v56 = vmul.f32 %v542_v46, %v131_v53  ;;  %v138_v57 = vmul.f32 %v544_v54, %v126_v47  ;;  %vm144_vm7 = vweird.f32 %v544_v54 }
 0x106   :  { %545 = vrsqrt.f32 %v54_v55  ;;  %vm145_vm9 = vmor %vm143_vm8, %vm144_vm7  ;;  %vm61_vm11 = vweird.f32 %v54_v55  ;;  %vm287_vm7 = vcmask 64512   ;;  %vm342_vm8 = vcmask 1041409  }
 0x107   :  { %v136_v59 = vsel %vm135_vm6, %v542_v46, %v132_v56  ;;  %v139_v60 = vmul.f32 %v544_v54, %v138_v57 }
 0x108   :  { %v147_v61 = vmul.f32 %v136_v59, %v113_v21 }
 0x109   :  { %v140_v63 = vmul.f32 0.5, %v139_v60 }
 0x10a   :  { %v150_v0 = vmul.f32 %v529_v58, %v147_v61 }
 0x10b   :  { %v141_v1 = vsub.f32 1.5, %v140_v63 }
 0x10c   :  { %v546_v2 = vpop.eup %545  ;;  %v153_v3 = vadd.f32 %v530_v62, %v150_v0 }
 0x10d   :  { %v142_v4 = vmul.f32 %v544_v54, %v141_v1  ;;  %v56_v5 = vmul.f32 %v546_v2, %v54_v55  ;;  %vm62_vm10 = vweird.f32 %v546_v2 }
 0x10e   :  { %512 = vmatmul.msk.f32.vlgmr.msra.gmra.mxu1 %vm97_vm0, %v153_v3  ;;  %vm63_vm12 = vmor %vm61_vm11, %vm62_vm10 }
 0x10f   :  { %v146_v6 = vsel %vm145_vm9, %v544_v54, %v142_v4  ;;  %v57_v7 = vmul.f32 %v546_v2, %v56_v5  ;;  %v22_v5 = vld [vmem:[%s750_s1 + $0x38] sm:$0xff]  ;;  %vm370_vm9 = vcmask 123904  }
 0x110   :  { %v148_v8 = vmul.f32 %v146_v6, %v114_v29  ;;  %v21_v6 = vld [vmem:[%s750_s1 + $0x30] sm:$0xff] }
 0x111   :  { %v58_v9 = vmul.f32 0.5, %v57_v7 }
 0x112   :  { %v151_v10 = vmul.f32 %v529_v58, %v148_v8 }
 0x113   :  { %v59_v11 = vsub.f32 1.5, %v58_v9 }
 0x114   :  { %v154_v12 = vadd.f32 %v530_v62, %v151_v10 }
 0x115   :  { %v60_v13 = vmul.f32 %v546_v2, %v59_v11  ;;  %v532_v11 = vld [vmem:[%s751_s2 + $0x7] ss:$0 sm:$0xff] }
 0x116   :  { %513 = vmatmul.msk.f32.gmra.mxu1 %vm97_vm0, %v154_v12  ;;  %v528_v12 = vld [vmem:[%s751_s2] ss:$0 sm:$0xff] }
 0x117   :  { %v64_v14 = vsel %vm63_vm12, %v546_v2, %v60_v13 }
 0x118   :  { %v65_v16 = vmul.f32 %v64_v14, %v625_v31 }
 0x11a   :  { %v66_v18 = vmul.f32 %v65_v16, %v34_v15 }
 0x11c   :  { %v67_v19 = vadd.f32 %v66_v18, %v35_v17 }
 0x11e   :  { %511 = vmatmul.msk.f32.vlgmr.msra.gmra.mxu0 %vm69_vm13, %v67_v19 }
 0x18b   :  { %v180_v21 = vpop.f32.mrf.mxu1 }
 0x18c   :  { %v181_v22 = vadd.f32 %v531_v20, %v180_v21 }
 0x18e   :  { %514 = vmatpush.xpose.msk.msra.mxu2 %vm69_vm13, %v181_v22 }
 0x193   :  { %v183_v24 = vpop.f32.mrf.mxu1 }
 0x194   :  { %v184_v25 = vadd.f32 %v531_v20, %v183_v24  ;;  %v23_v24 = vld [vmem:[%s750_s1 + $0x40] sm:$0xff] }
 0x196   :  { %516 = vmatpush.xpose.msk.msra.mxu3 %vm69_vm13, %v184_v25 }
 0x19a   :  { %360 = vmatpush.msrb.mxu3 %v22_v5 }
 0x19b   :  { %v90_v27 = vpop.f32.mrf.mxu0 }
 0x19c   :  { %v91_v28 = vadd.f32 %v90_v27, %v68_v26  ;;  %361 = vmatpush.msrb.mxu3 %v21_v6 }
 0x19e   :  { %515 = vmatmul.msk.f32.vlgmr.msra.gmra.mxu2 %vm69_vm13, %v91_v28  ;;  %517 = vmatmul.msk.f32.vlgmr.msra.gmra.mxu3 %vm69_vm13, %v91_v28 }
 0x221   :  { %v209_v29 = vpop.f32.mrf.mxu2  ;;  %v232_v30 = vpop.f32.mrf.mxu3 }
 0x222   :  { %v239_v31 = vsel %vm235_vm14, %v232_v30, -inf  ;;  %v236_v32 = vsel %vm235_vm14, %v209_v29, -inf }
 0x223   :  { %240 = vmax.xlane.f32.xlu0 %v239_v31  ;;  %237 = vmax.xlane.f32.xlu1 %v236_v32 }
 0x23c   :  { %311 = vrot.lane.b32.xlu1 %v184_v25, %s587_s14 }
 0x296   :  { %v241_v33 = vpop.xlane.xlu0 %240  ;;  %v238_v34 = vpop.xlane.xlu1 %237 }
 0x297   :  { %v243_v35 = vsub.f32 %v232_v30, %v241_v33  ;;  %v242_v36 = vsub.f32 %v209_v29, %v238_v34  ;;  %v533_v34 = vld [vmem:[%s751_s2 + $0x8] ss:$0 sm:$0xff] }
 0x299   :  { %v246_v37 = vmul.f32 1.442695, %v243_v35  ;;  %v244_v38 = vmul.f32 1.442695, %v242_v36 }
 0x29b   :  { %547 = vpow2.f32 %v246_v37 }
 0x29c   :  { %549 = vpow2.f32 %v244_v38 }
 0x2a1   :  { %v548_v39 = vpop.eup %547 }
 0x2a2   :  { %v550_v40 = vpop.eup %549  ;;  %v251_v41 = vsel %vm235_vm14, %v548_v39, 0.0 }
 0x2a3   :  { %252 = vadd.xlane.f32.xlu2 %v251_v41  ;;  %v248_v42 = vsel %vm235_vm14, %v550_v40, 0.0 }
 0x2a4   :  { %249 = vadd.xlane.f32.xlu0 %v248_v42 }
 0x2ae   :  { %v312_v43 = vpop.permute.xlu1 %311 }
 0x2af   :  { %332 = vmatpush.msrb.mxu2 %v312_v43 }
 0x2bb   :  { %284 = vrot.lane.b32.xlu2 %v181_v22, %s587_s14  ;;  %v24_v22 = vld [vmem:[%s750_s1 + $0x48] sm:$0xff] }
 0x316   :  { %v253_v44 = vpop.xlane.xlu2 %252 }
 0x317   :  { %551 = vrcp.f32 %v253_v44  ;;  %v250_v45 = vpop.xlane.xlu0 %249  ;;  %v280_v52 = vand.u32 2147483648, %v253_v44  ;;  %v278_v55 = vand.u32 2147483647, %v253_v44  ;;  %vm274_vm1 = vweird.f32 %v253_v44 }
 0x318   :  { %553 = vrcp.f32 %v250_v45  ;;  %v265_v56 = vand.u32 2147483648, %v250_v45  ;;  %v263_v58 = vand.u32 2147483647, %v250_v45  ;;  %vm259_vm3 = vweird.f32 %v250_v45 }
 0x319   :  { %v281_v60 = vor.u32 1.1754944e-38, %v280_v52  ;;  %vm279_vm4 = vcmp.eq.f32.partialorder %v278_v55, 8.507059e+37 }
 0x31a   :  { %v266_v62 = vor.u32 1.1754944e-38, %v265_v56  ;;  %vm264_vm6 = vcmp.eq.f32.partialorder %v263_v58, 8.507059e+37  ;;  %v28_v56 = vld [vmem:[%s750_s1 + $0x68] sm:$0xff] }
 0x31d   :  { %v552_v46 = vpop.eup %551 }
 0x31e   :  { %v554_v47 = vpop.eup %553  ;;  %v270_v48 = vmul.f32 %v552_v46, %v253_v44  ;;  %v285_v49 = vpop.permute.xlu2 %284  ;;  %vm275_vm15 = vweird.f32 %v552_v46 }
 0x31f   :  { %v255_v50 = vmul.f32 %v554_v47, %v250_v45  ;;  %306 = vmatpush.msrb.mxu0 %v285_v49  ;;  %vm260_vm0 = vweird.f32 %v554_v47  ;;  %vm276_vm2 = vmor %vm274_vm1, %vm275_vm15  ;;  %v32_v45 = vld [vmem:[%s750_s1 + $0x88] sm:$0xff]  ;;  %vm466_vm1 = vcmask 523264  }
 0x320   :  { %v271_v51 = vsub.f32 1.0, %v270_v48  ;;  %vm261_vm5 = vmor %vm259_vm3, %vm260_vm0  ;;  %478 = vmatpush.msrb.mxu1 %v32_v45  ;;  %v31_v48 = vld [vmem:[%s750_s1 + $0x80] sm:$0xff] }
 0x321   :  { %v256_v53 = vsub.f32 1.0, %v255_v50  ;;  %416 = vmatpush.msra.mxu0 %v24_v22 }
 0x322   :  { %v272_v54 = vmul.f32 %v552_v46, %v271_v51  ;;  %479 = vmatpush.msrb.mxu1 %v31_v48  ;;  %v30_v51 = vld [vmem:[%s750_s1 + $0x78] sm:$0xff] }
 0x323   :  { %v257_v57 = vmul.f32 %v554_v47, %v256_v53  ;;  %417 = vmatpush.msra.mxu0 %v23_v24 }
 0x324   :  { %v273_v59 = vadd.f32 %v552_v46, %v272_v54  ;;  %480 = vmatpush.msrb.mxu1 %v30_v51  ;;  %v29_v54 = vld [vmem:[%s750_s1 + $0x70] sm:$0xff] }
 0x325   :  { %v258_v61 = vadd.f32 %v554_v47, %v257_v57 }
 0x326   :  { %v277_v63 = vsel %vm276_vm2, %v552_v46, %v273_v59  ;;  %481 = vmatpush.msrb.mxu1 %v29_v54  ;;  %v27_v59 = vld [vmem:[%s750_s1 + $0x60] sm:$0xff] }
 0x327   :  { %v262_v0 = vsel %vm261_vm5, %v554_v47, %v258_v61  ;;  %v282_v1 = vsel %vm279_vm4, %v281_v60, %v277_v63  ;;  %v26_v61 = vld [vmem:[%s750_s1 + $0x58] sm:$0xff]  ;;  %v25_v63 = vld [vmem:[%s750_s1 + $0x50] sm:$0xff] }
 0x328   :  { %v267_v2 = vsel %vm264_vm6, %v266_v62, %v262_v0  ;;  %v283_v3 = vmul.f32 %v548_v39, %v282_v1  ;;  %v535_v39 = vld [vmem:[%s751_s2 + $0xa] ss:$0 sm:$0xff]  ;;  %482 = vmatpush.msrb.mxu1 %v28_v56 }
 0x329   :  { %v268_v4 = vmul.f32 %v550_v40, %v267_v2 }
 0x32a   :  { %519 = vmatmul.msk.f32.vlgmr.msrb.gmra.mxu2 %vm287_vm7, %v283_v3  ;;  %483 = vmatpush.msrb.mxu1 %v27_v59 }
 0x32b   :  { %518 = vmatmul.msk.f32.vlgmr.msrb.gmra.mxu0 %vm287_vm7, %v268_v4 }
 0x32c   :  { %484 = vmatpush.msrb.mxu1 %v26_v61 }
 0x32e   :  { %485 = vmatpush.msrb.mxu1 %v25_v63 }
 0x3a8   :  { %v308_v9 = vpop.f32.mrf.mxu0 }
 0x3ad   :  { %v334_v7 = vpop.f32.mrf.mxu2 }
 0x3ae   :  { %v341_v8 = vrot.slane %v334_v7, 7 }
 0x3b0   :  { %v343_v10 = vsel %vm342_vm8, %v341_v8, %v308_v9 }
 0x3b1   :  { %520 = vmatmul.msk.f32.vlgmr.msrb.gmra.mxu3 %vm69_vm13, %v343_v10 }
 0x434   :  { %v363_v13 = vpop.f32.mrf.mxu3 }
 0x435   :  { %v364_v14 = vadd.f32 %v532_v11, %v363_v13 }
 0x437   :  { %v693_v15 = vadd.f32 %v528_v12, %v364_v14 }
 0x439   :  { %v371_v16 = vsel %vm370_vm9, %v693_v15, 0.0 }
 0x43a   :  { %372 = vadd.xlane.f32.xlu0 %v371_v16 }
 0x4ad   :  { %v373_v17 = vpop.xlane.xlu0 %372 }
 0x4ae   :  { %v374_v18 = vmul.f32 %v373_v17, %v621_v23 }
 0x4b0   :  { %v375_v19 = vsub.f32 %v693_v15, %v374_v18 }
 0x4b2   :  { %v376_v20 = vmul.f32 %v375_v19, %v375_v19 }
 0x4b4   :  { %v377_v21 = vsel %vm370_vm9, %v376_v20, 0.0 }
 0x4b5   :  { %378 = vadd.xlane.f32.xlu0 %v377_v21 }
 0x528   :  { %v379_v25 = vpop.xlane.xlu0 %378 }
 0x529   :  { %v380_v26 = vmul.f32 %v379_v25, %v621_v23  ;;  %v534_v23 = vld [vmem:[%s751_s2 + $0x9] ss:$0 sm:$0xff] }
 0x52b   :  { %v381_v27 = vadd.f32 1e-05, %v380_v26 }
 0x52d   :  { %555 = vrsqrt.f32 %v381_v27  ;;  %vm388_vm11 = vweird.f32 %v381_v27 }
 0x533   :  { %v556_v28 = vpop.eup %555 }
 0x534   :  { %v383_v29 = vmul.f32 %v556_v28, %v381_v27  ;;  %vm389_vm10 = vweird.f32 %v556_v28  ;;  %v536_v27 = vld [vmem:[%s751_s2 + $0xb] ss:$0 sm:$0xff] }
 0x535   :  { %vm390_vm12 = vmor %vm388_vm11, %vm389_vm10 }
 0x536   :  { %v384_v30 = vmul.f32 %v556_v28, %v383_v29 }
 0x538   :  { %v385_v31 = vmul.f32 0.5, %v384_v30 }
 0x53a   :  { %v386_v32 = vsub.f32 1.5, %v385_v31 }
 0x53c   :  { %v387_v33 = vmul.f32 %v556_v28, %v386_v32 }
 0x53e   :  { %v391_v35 = vsel %vm390_vm12, %v556_v28, %v387_v33 }
 0x53f   :  { %v392_v36 = vmul.f32 %v391_v35, %v375_v19 }
 0x541   :  { %v394_v37 = vmul.f32 %v533_v34, %v392_v36 }
 0x543   :  { %v396_v38 = vadd.f32 %v534_v23, %v394_v37 }
 0x545   :  { %521 = vmatmul.msk.f32.vlgmr.msra.gmra.mxu0 %vm69_vm13, %v396_v38 }
 0x5c2   :  { %v419_v40 = vpop.f32.mrf.mxu0 }
 0x5c3   :  { %v420_v41 = vadd.f32 %v535_v39, %v419_v40 }
 0x5c5   :  { %v423_v42 = vmul.f32 0.70710677, %v420_v41  ;;  %v422_v24 = vmul.f32 0.5, %v420_v41 }
 0x5c7   :  { %v424_v43 = vmul.f32 %v423_v42, %v423_v42 }
 0x5c9   :  { %v425_v44 = vmin.f32 %v424_v43, 16.0 }
 0x5cb   :  { %v426_v46 = vmul.f32 2.1237322e-06, %v425_v44  ;;  %v437_v47 = vmul.f32 3.8918573e-05, %v425_v44 }
 0x5cd   :  { %v427_v49 = vadd.f32 0.00028619796, %v426_v46  ;;  %v438_v50 = vadd.f32 0.001143296, %v437_v47 }
 0x5cf   :  { %v428_v52 = vmul.f32 %v427_v49, %v425_v44  ;;  %v439_v53 = vmul.f32 %v438_v50, %v425_v44 }
 0x5d1   :  { %v440_v55 = vadd.f32 0.014752088, %v439_v53  ;;  %v429_v57 = vadd.f32 0.0036580483, %v428_v52 }
 0x5d3   :  { %v441_v58 = vmul.f32 %v440_v55, %v425_v44  ;;  %v430_v62 = vmul.f32 %v429_v57, %v425_v44 }
 0x5d5   :  { %v442_v60 = vadd.f32 0.112945676, %v441_v58  ;;  %v431_v2 = vadd.f32 0.05243302, %v430_v62 }
 0x5d7   :  { %v443_v0 = vmul.f32 %v442_v60, %v425_v44  ;;  %v432_v5 = vmul.f32 %v431_v2, %v425_v44 }
 0x5d9   :  { %v444_v1 = vadd.f32 0.4994258, %v443_v0  ;;  %v433_v6 = vadd.f32 0.18741608, %v432_v5 }
 0x5db   :  { %v445_v3 = vmul.f32 %v444_v1, %v425_v44  ;;  %v434_v8 = vmul.f32 %v433_v6, %v425_v44 }
 0x5dd   :  { %v446_v4 = vadd.f32 1.0, %v445_v3  ;;  %v435_v12 = vadd.f32 1.1283791, %v434_v8 }
 0x5df   :  { %557 = vrcp.f32 %v446_v4  ;;  %v458_v11 = vand.u32 2147483648, %v446_v4  ;;  %v456_v14 = vand.u32 2147483647, %v446_v4  ;;  %vm452_vm14 = vweird.f32 %v446_v4 }
 0x5e0   :  { %v436_v18 = vmul.f32 %v435_v12, %v423_v42 }
 0x5e1   :  { %v459_v17 = vor.u32 1.1754944e-38, %v458_v11  ;;  %vm457_vm0 = vcmp.eq.f32.partialorder %v456_v14, 8.507059e+37 }
 0x5e5   :  { %v558_v7 = vpop.eup %557 }
 0x5e6   :  { %v448_v9 = vmul.f32 %v558_v7, %v446_v4  ;;  %vm453_vm13 = vweird.f32 %v558_v7 }
 0x5e7   :  { %vm454_vm15 = vmor %vm452_vm14, %vm453_vm13 }
 0x5e8   :  { %v449_v10 = vsub.f32 1.0, %v448_v9 }
 0x5ea   :  { %v450_v13 = vmul.f32 %v558_v7, %v449_v10 }
 0x5ec   :  { %v451_v16 = vadd.f32 %v558_v7, %v450_v13 }
 0x5ee   :  { %v455_v19 = vsel %vm454_vm15, %v558_v7, %v451_v16 }
 0x5ef   :  { %v460_v20 = vsel %vm457_vm0, %v459_v17, %v455_v19 }
 0x5f0   :  { %v461_v21 = vmul.f32 %v460_v20, %v436_v18 }
 0x5f2   :  { %v522_v22 = vclamps-f32 %v461_v21, 1.0 }
 0x5f4   :  { %v464_v25 = vadd.f32 1.0, %v522_v22 }
 0x5f6   :  { %v465_v26 = vmul.f32 %v464_v25, %v422_v24 }
 0x5f8   :  { %523 = vmatmul.msk.f32.vlgmr.msrb.gmra.mxu1 %vm466_vm1, %v465_v26 }
 0x675   :  { %v487_v28 = vpop.f32.mrf.mxu1 }
 0x676   :  { %v490_v29 = vadd.f32 %v487_v28, %v693_v15 }
 0x678   :  { %v493_v30 = vadd.f32 %v536_v27, %v490_v29 }
 0x67a   :  { %494 = vst.msk [vmem:[#allocation2] sm:$0x3] %vm370_vm9, %v493_v30 }
 0x67b   :  { %505 = dma.vmem_to_hbm [thread:$0]  %s501_s22, 32, %s503_s25, [#allocation3]  }
 0x67c   :  { %583 = dma.done.wait [#allocation3], 32  }
 0x67d   :  { %584 = vsyncadd [#allocation3], 4294967264 }
 0x67e   :  { %510 = vsyncpa [#allocation3], 1 }

</bundles_post_ra>
